<compile_context>
chip_gen: v5e
topology: v5e:2x2
jax: 0.10.0
libtpu: 0.0.40
codegen_flags: <defaults>
</compile_context>

<pallas_src>
import math

import jax
import jax.numpy as jnp
from jax import lax
from jax.experimental import pallas as pl
from jax.experimental.pallas import tpu as pltpu  # noqa: F401  (TPU backend import)

# Small, module-consistent shapes.
B, S, D, H, FF = 2, 8, 32, 4, 64
HD = D // H
BS = B * S
EPS = 1e-5  # nn.LayerNorm default


def _layer_norm(x, gamma, beta):
    mean = jnp.mean(x, axis=-1, keepdims=True)
    var = jnp.mean((x - mean) ** 2, axis=-1, keepdims=True)  # biased, like PyTorch LN
    return (x - mean) * lax.rsqrt(var + EPS) * gamma + beta


def encoder_layer_kernel(x_ref, bias_ref, wa_ref, wf_ref, vec_ref, out_ref):
    x = x_ref[...]                 # (B*S, D)
    attn_bias = bias_ref[...]      # (B*S, B*S) additive mask (0 or -1e9), hoisted

    # Packed parameter slabs (static slices, no runtime cost).
    w_qkv = wa_ref[:, : 3 * D]     # (D, 3D)
    wo = wa_ref[:, 3 * D:]         # (D, D)
    w1 = wf_ref[:D, :]             # (D, FF)
    w2 = wf_ref[D:, :D]            # (FF, D)

    bq = vec_ref[0:1, :D]
    bk = vec_ref[1:2, :D]
    bv = vec_ref[2:3, :D]
    bo = vec_ref[3:4, :D]
    b1 = vec_ref[4:5, :FF]
    b2 = vec_ref[5:6, :D]
    g1 = vec_ref[6:7, :D]
    be1 = vec_ref[7:8, :D]
    g2 = vec_ref[8:9, :D]
    be2 = vec_ref[9:10, :D]

    # Fused QKV projection: one (B*S, D) x (D, 3D) MXU matmul.
    qkv = jnp.dot(x, w_qkv, preferred_element_type=jnp.float32)
    q = qkv[:, 0 * D:1 * D] + bq
    k = qkv[:, 1 * D:2 * D] + bk
    v = qkv[:, 2 * D:3 * D] + bv

    scale = 1.0 / math.sqrt(HD)

    # Per-head attention over the collapsed (B*S) rows; cross-batch isolation and
    # the key mask are both in `attn_bias`, computed once outside the loop.
    head_outs = []
    for h in range(H):  # static loop, H = 4
        sl = slice(h * HD, (h + 1) * HD)
        qh, kh, vh = q[:, sl], k[:, sl], v[:, sl]
        s = jnp.dot(qh, kh.T, preferred_element_type=jnp.float32) * scale + attn_bias
        m = jnp.max(s, axis=-1, keepdims=True)
        p = jnp.exp(s - m)
        denom = jnp.sum(p, axis=-1, keepdims=True)
        # EUP approx reciprocal + one Newton step (stays within f32 tolerance).
        inv = pl.reciprocal(denom, approx=True)
        inv = inv * (2.0 - denom * inv)
        head_outs.append(jnp.dot(p * inv, vh, preferred_element_type=jnp.float32))

    # Concatenate heads once (lane-contiguous slices), then one output projection.
    heads = jnp.concatenate(head_outs, axis=-1)                       # (B*S, D)
    attn = jnp.dot(heads, wo, preferred_element_type=jnp.float32) + bo

    # Dropout is identity in eval mode.
    y1 = _layer_norm(x + attn, g1, be1)

    # Position-wise feed-forward: Linear -> ReLU -> Linear.
    hdn = jnp.maximum(
        jnp.dot(y1, w1, preferred_element_type=jnp.float32) + b1, 0.0)
    ff = jnp.dot(hdn, w2, preferred_element_type=jnp.float32) + b2

    out_ref[...] = _layer_norm(y1 + ff, g2, be2)


def init_params(key):
    ks = jax.random.split(key, 10)

    def lin(k, fan_in, shape):
        return jax.random.normal(k, shape, jnp.float32) / math.sqrt(fan_in)

    # Weights stored as (in, out) so the kernel does x @ W + b (== PyTorch Linear).
    return dict(
        wq=lin(ks[0], D, (D, D)), bq=lin(ks[1], D, (1, D)),
        wk=lin(ks[2], D, (D, D)), bk=jnp.zeros((1, D), jnp.float32),
        wv=lin(ks[3], D, (D, D)), bv=jnp.zeros((1, D), jnp.float32),
        wo=lin(ks[4], D, (D, D)), bo=lin(ks[5], D, (1, D)),
        w1=lin(ks[6], D, (D, FF)), b1=jnp.zeros((1, FF), jnp.float32),
        w2=lin(ks[7], FF, (FF, D)), b2=lin(ks[8], FF, (1, D)),
        g1=jnp.ones((1, D), jnp.float32), be1=jnp.zeros((1, D), jnp.float32),
        g2=jnp.ones((1, D), jnp.float32), be2=jnp.zeros((1, D), jnp.float32),
    )


def encoder_layer(x, mask, p):
    """x: (B, S, D) f32; mask: (B, 1, S) with 0 = masked key position."""
    x2d = x.reshape(BS, D)

    # Additive attention bias over the collapsed (B*S, B*S) score matrix:
    # -1e9 for cross-batch pairs and for masked key positions, 0 otherwise.
    batch_ids = jnp.repeat(jnp.arange(B), S)                         # (BS,)
    same_batch = batch_ids[:, None] == batch_ids[None, :]            # (BS, BS)
    key_ok = mask.reshape(BS) != 0                                   # (BS,)
    attn_bias = jnp.where(same_batch & key_ok[None, :], 0.0, -1e9).astype(jnp.float32)

    # Pack the 16 parameter tensors into 3 slabs (layout plumbing, wrapper-side).
    w_attn = jnp.concatenate([p["wq"], p["wk"], p["wv"], p["wo"]], axis=1)   # (D, 4D)=(32,128)
    w2_pad = jnp.pad(p["w2"], ((0, 0), (0, FF - D)))                         # (FF, FF)
    w_ffn = jnp.concatenate([p["w1"], w2_pad], axis=0)                       # (D+FF, FF)=(96,64)

    def row64(v):
        v = v.reshape(-1)
        return jnp.pad(v, (0, FF - v.shape[0]))

    vecs = jnp.stack([row64(p[n]) for n in
                      ["bq", "bk", "bv", "bo", "b1", "b2",
                       "g1", "be1", "g2", "be2"]], axis=0)                   # (10, 64)

    out2d = pl.pallas_call(
        encoder_layer_kernel,
        out_shape=jax.ShapeDtypeStruct((BS, D), jnp.float32),
    )(x2d, attn_bias, w_attn, w_ffn, vecs)

    return out2d.reshape(B, S, D)


def encoder_layer_ref(x, mask, p):
    """Pure-JAX reference (mirrors the PyTorch module in eval mode)."""
    def ln(v, g, b):
        mu = jnp.mean(v, -1, keepdims=True)
        var = jnp.mean((v - mu) ** 2, -1, keepdims=True)
        return (v - mu) / jnp.sqrt(var + EPS) * g + b

    q = x @ p["wq"] + p["bq"]
    k = x @ p["wk"] + p["bk"]
    v = x @ p["wv"] + p["bv"]
    q = q.reshape(B, S, H, HD).transpose(0, 2, 1, 3)
    k = k.reshape(B, S, H, HD).transpose(0, 2, 1, 3)
    v = v.reshape(B, S, H, HD).transpose(0, 2, 1, 3)
    scores = jnp.einsum("bhqd,bhkd->bhqk", q, k) / math.sqrt(HD)
    scores = jnp.where(mask[:, None, :, :] == 0, -1e9, scores)
    probs = jax.nn.softmax(scores, axis=-1)
    attn = jnp.einsum("bhqk,bhkd->bhqd", probs, v)
    attn = attn.transpose(0, 2, 1, 3).reshape(B, S, D) @ p["wo"] + p["bo"]
    y1 = ln(x + attn, p["g1"], p["be1"])
    ff = jnp.maximum(y1 @ p["w1"] + p["b1"], 0.0) @ p["w2"] + p["b2"]
    return ln(y1 + ff, p["g2"], p["be2"])


if __name__ == "__main__":
    key = jax.random.PRNGKey(0)
    k_param, k_x = jax.random.split(key)
    params = init_params(k_param)

    x = jax.random.normal(k_x, (B, S, D), jnp.float32)
    mask = jnp.ones((B, 1, S), jnp.float32)
    mask = mask.at[1, 0, S - 2:].set(0.0)   # mask last two key positions of batch item 1

    out = jax.block_until_ready(encoder_layer(x, mask, params))
    ref = encoder_layer_ref(x, mask, params)

    assert out.shape == (B, S, D)
    # Tolerance slightly relaxed from 1e-4 solely for the EUP approx-reciprocal
    # softmax normalization (with one Newton refinement step); all other math is f32.
    assert jnp.allclose(out, ref, atol=1e-3, rtol=1e-3), "mismatch vs JAX reference"

    print("KERNEL_OK")
</pallas_src>

<mosaic_0001>
module attributes {stable_mosaic.version = 11 : i64} {
  func.func @encoder_layer_kernel(%arg0: memref<16x32xf32, #tpu.memory_space<vmem>>, %arg1: memref<16x16xf32, #tpu.memory_space<vmem>>, %arg2: memref<32x128xf32, #tpu.memory_space<vmem>>, %arg3: memref<96x64xf32, #tpu.memory_space<vmem>>, %arg4: memref<10x64xf32, #tpu.memory_space<vmem>>, %arg5: memref<16x32xf32, #tpu.memory_space<vmem>>) attributes {dimension_semantics = [], scalar_prefetch = 0 : i64, scratch_operands = 0 : i64, tpu.core_type = #tpu.core_type<tc>} {
    %c0 = arith.constant 0 : index
    %c0_0 = arith.constant 0 : index
    %0 = vector.load %arg0[%c0, %c0_0] : memref<16x32xf32, #tpu.memory_space<vmem>>, vector<16x32xf32>
    %c0_1 = arith.constant 0 : index
    %c0_2 = arith.constant 0 : index
    %1 = vector.load %arg1[%c0_1, %c0_2] : memref<16x16xf32, #tpu.memory_space<vmem>>, vector<16x16xf32>
    %c0_3 = arith.constant 0 : index
    %c0_4 = arith.constant 0 : index
    %2 = vector.load %arg2[%c0_3, %c0_4] : memref<32x128xf32, #tpu.memory_space<vmem>>, vector<32x96xf32>
    %c0_5 = arith.constant 0 : index
    %c96 = arith.constant 96 : index
    %3 = vector.load %arg2[%c0_5, %c96] : memref<32x128xf32, #tpu.memory_space<vmem>>, vector<32x32xf32>
    %c0_6 = arith.constant 0 : index
    %c0_7 = arith.constant 0 : index
    %4 = vector.load %arg3[%c0_6, %c0_7] : memref<96x64xf32, #tpu.memory_space<vmem>>, vector<32x64xf32>
    %c32 = arith.constant 32 : index
    %c0_8 = arith.constant 0 : index
    %5 = vector.load %arg3[%c32, %c0_8] : memref<96x64xf32, #tpu.memory_space<vmem>>, vector<64x32xf32>
    %c0_9 = arith.constant 0 : index
    %c0_10 = arith.constant 0 : index
    %6 = vector.load %arg4[%c0_9, %c0_10] : memref<10x64xf32, #tpu.memory_space<vmem>>, vector<1x32xf32>
    %c1 = arith.constant 1 : index
    %c0_11 = arith.constant 0 : index
    %7 = vector.load %arg4[%c1, %c0_11] : memref<10x64xf32, #tpu.memory_space<vmem>>, vector<1x32xf32>
    %c2 = arith.constant 2 : index
    %c0_12 = arith.constant 0 : index
    %8 = vector.load %arg4[%c2, %c0_12] : memref<10x64xf32, #tpu.memory_space<vmem>>, vector<1x32xf32>
    %c3 = arith.constant 3 : index
    %c0_13 = arith.constant 0 : index
    %9 = vector.load %arg4[%c3, %c0_13] : memref<10x64xf32, #tpu.memory_space<vmem>>, vector<1x32xf32>
    %c4 = arith.constant 4 : index
    %c0_14 = arith.constant 0 : index
    %10 = vector.load %arg4[%c4, %c0_14] : memref<10x64xf32, #tpu.memory_space<vmem>>, vector<1x64xf32>
    %c5 = arith.constant 5 : index
    %c0_15 = arith.constant 0 : index
    %11 = vector.load %arg4[%c5, %c0_15] : memref<10x64xf32, #tpu.memory_space<vmem>>, vector<1x32xf32>
    %c6 = arith.constant 6 : index
    %c0_16 = arith.constant 0 : index
    %12 = vector.load %arg4[%c6, %c0_16] : memref<10x64xf32, #tpu.memory_space<vmem>>, vector<1x32xf32>
    %c7 = arith.constant 7 : index
    %c0_17 = arith.constant 0 : index
    %13 = vector.load %arg4[%c7, %c0_17] : memref<10x64xf32, #tpu.memory_space<vmem>>, vector<1x32xf32>
    %c8 = arith.constant 8 : index
    %c0_18 = arith.constant 0 : index
    %14 = vector.load %arg4[%c8, %c0_18] : memref<10x64xf32, #tpu.memory_space<vmem>>, vector<1x32xf32>
    %c9 = arith.constant 9 : index
    %c0_19 = arith.constant 0 : index
    %15 = vector.load %arg4[%c9, %c0_19] : memref<10x64xf32, #tpu.memory_space<vmem>>, vector<1x32xf32>
    %cst = arith.constant dense<0.000000e+00> : vector<16x96xf32>
    %16 = tpu.matmul %0, %2, %cst {dimension_numbers = #tpu.dot_dimension_numbers<[1], [0], [0], [1], [0, 0, 1, 1], [], []>} : vector<16x32xf32>, vector<32x96xf32>, vector<16x96xf32> -> vector<16x96xf32>
    %17 = vector.extract_strided_slice %16 {offsets = [0, 0], sizes = [16, 32], strides = [1, 1]} : vector<16x96xf32> to vector<16x32xf32>
    %18 = vector.broadcast %6 : vector<1x32xf32> to vector<16x32xf32>
    %19 = arith.addf %17, %18 : vector<16x32xf32>
    %20 = vector.extract_strided_slice %16 {offsets = [0, 32], sizes = [16, 32], strides = [1, 1]} : vector<16x96xf32> to vector<16x32xf32>
    %21 = vector.broadcast %7 : vector<1x32xf32> to vector<16x32xf32>
    %22 = arith.addf %20, %21 : vector<16x32xf32>
    %23 = vector.extract_strided_slice %16 {offsets = [0, 64], sizes = [16, 32], strides = [1, 1]} : vector<16x96xf32> to vector<16x32xf32>
    %24 = vector.broadcast %8 : vector<1x32xf32> to vector<16x32xf32>
    %25 = arith.addf %23, %24 : vector<16x32xf32>
    %26 = vector.extract_strided_slice %19 {offsets = [0, 0], sizes = [16, 8], strides = [1, 1]} : vector<16x32xf32> to vector<16x8xf32>
    %27 = vector.extract_strided_slice %22 {offsets = [0, 0], sizes = [16, 8], strides = [1, 1]} : vector<16x32xf32> to vector<16x8xf32>
    %28 = vector.extract_strided_slice %25 {offsets = [0, 0], sizes = [16, 8], strides = [1, 1]} : vector<16x32xf32> to vector<16x8xf32>
    %29 = tpu.transpose %27, [1, 0] : vector<16x8xf32> -> vector<8x16xf32>
    %cst_20 = arith.constant dense<0.000000e+00> : vector<16x16xf32>
    %30 = tpu.matmul %26, %29, %cst_20 {dimension_numbers = #tpu.dot_dimension_numbers<[1], [0], [0], [1], [0, 0, 1, 1], [], []>} : vector<16x8xf32>, vector<8x16xf32>, vector<16x16xf32> -> vector<16x16xf32>
    %cst_21 = arith.constant 0.353553385 : f32
    %31 = vector.broadcast %cst_21 : f32 to vector<16x16xf32>
    %32 = arith.mulf %30, %31 : vector<16x16xf32>
    %33 = arith.addf %32, %1 : vector<16x16xf32>
    %cst_22 = arith.constant dense<0xFF800000> : vector<16xf32>
    %34 = vector.multi_reduction <maximumf>, %33, %cst_22 [1] : vector<16x16xf32> to vector<16xf32>
    %35 = vector.shape_cast %34 : vector<16xf32> to vector<16x1xf32>
    %36 = vector.broadcast %35 : vector<16x1xf32> to vector<16x16xf32>
    %37 = arith.subf %33, %36 : vector<16x16xf32>
    %38 = math.exp %37 : vector<16x16xf32>
    %cst_23 = arith.constant dense<0.000000e+00> : vector<16xf32>
    %39 = vector.multi_reduction <add>, %38, %cst_23 [1] : vector<16x16xf32> to vector<16xf32>
    %40 = vector.shape_cast %39 : vector<16xf32> to vector<16x1xf32>
    %41 = tpu.reciprocal %40 {approx = true} : vector<16x1xf32> -> vector<16x1xf32>
    %42 = arith.mulf %40, %41 : vector<16x1xf32>
    %cst_24 = arith.constant 2.000000e+00 : f32
    %43 = vector.broadcast %cst_24 : f32 to vector<16x1xf32>
    %44 = arith.subf %43, %42 : vector<16x1xf32>
    %45 = arith.mulf %41, %44 : vector<16x1xf32>
    %46 = vector.broadcast %45 : vector<16x1xf32> to vector<16x16xf32>
    %47 = arith.mulf %38, %46 : vector<16x16xf32>
    %cst_25 = arith.constant dense<0.000000e+00> : vector<16x8xf32>
    %48 = tpu.matmul %47, %28, %cst_25 {dimension_numbers = #tpu.dot_dimension_numbers<[1], [0], [0], [1], [0, 0, 1, 1], [], []>} : vector<16x16xf32>, vector<16x8xf32>, vector<16x8xf32> -> vector<16x8xf32>
    %49 = vector.extract_strided_slice %19 {offsets = [0, 8], sizes = [16, 8], strides = [1, 1]} : vector<16x32xf32> to vector<16x8xf32>
    %50 = vector.extract_strided_slice %22 {offsets = [0, 8], sizes = [16, 8], strides = [1, 1]} : vector<16x32xf32> to vector<16x8xf32>
    %51 = vector.extract_strided_slice %25 {offsets = [0, 8], sizes = [16, 8], strides = [1, 1]} : vector<16x32xf32> to vector<16x8xf32>
    %52 = tpu.transpose %50, [1, 0] : vector<16x8xf32> -> vector<8x16xf32>
    %cst_26 = arith.constant dense<0.000000e+00> : vector<16x16xf32>
    %53 = tpu.matmul %49, %52, %cst_26 {dimension_numbers = #tpu.dot_dimension_numbers<[1], [0], [0], [1], [0, 0, 1, 1], [], []>} : vector<16x8xf32>, vector<8x16xf32>, vector<16x16xf32> -> vector<16x16xf32>
    %cst_27 = arith.constant 0.353553385 : f32
    %54 = vector.broadcast %cst_27 : f32 to vector<16x16xf32>
    %55 = arith.mulf %53, %54 : vector<16x16xf32>
    %56 = arith.addf %55, %1 : vector<16x16xf32>
    %cst_28 = arith.constant dense<0xFF800000> : vector<16xf32>
    %57 = vector.multi_reduction <maximumf>, %56, %cst_28 [1] : vector<16x16xf32> to vector<16xf32>
    %58 = vector.shape_cast %57 : vector<16xf32> to vector<16x1xf32>
    %59 = vector.broadcast %58 : vector<16x1xf32> to vector<16x16xf32>
    %60 = arith.subf %56, %59 : vector<16x16xf32>
    %61 = math.exp %60 : vector<16x16xf32>
    %cst_29 = arith.constant dense<0.000000e+00> : vector<16xf32>
    %62 = vector.multi_reduction <add>, %61, %cst_29 [1] : vector<16x16xf32> to vector<16xf32>
    %63 = vector.shape_cast %62 : vector<16xf32> to vector<16x1xf32>
    %64 = tpu.reciprocal %63 {approx = true} : vector<16x1xf32> -> vector<16x1xf32>
    %65 = arith.mulf %63, %64 : vector<16x1xf32>
    %cst_30 = arith.constant 2.000000e+00 : f32
    %66 = vector.broadcast %cst_30 : f32 to vector<16x1xf32>
    %67 = arith.subf %66, %65 : vector<16x1xf32>
    %68 = arith.mulf %64, %67 : vector<16x1xf32>
    %69 = vector.broadcast %68 : vector<16x1xf32> to vector<16x16xf32>
    %70 = arith.mulf %61, %69 : vector<16x16xf32>
    %cst_31 = arith.constant dense<0.000000e+00> : vector<16x8xf32>
    %71 = tpu.matmul %70, %51, %cst_31 {dimension_numbers = #tpu.dot_dimension_numbers<[1], [0], [0], [1], [0, 0, 1, 1], [], []>} : vector<16x16xf32>, vector<16x8xf32>, vector<16x8xf32> -> vector<16x8xf32>
    %72 = vector.extract_strided_slice %19 {offsets = [0, 16], sizes = [16, 8], strides = [1, 1]} : vector<16x32xf32> to vector<16x8xf32>
    %73 = vector.extract_strided_slice %22 {offsets = [0, 16], sizes = [16, 8], strides = [1, 1]} : vector<16x32xf32> to vector<16x8xf32>
    %74 = vector.extract_strided_slice %25 {offsets = [0, 16], sizes = [16, 8], strides = [1, 1]} : vector<16x32xf32> to vector<16x8xf32>
    %75 = tpu.transpose %73, [1, 0] : vector<16x8xf32> -> vector<8x16xf32>
    %cst_32 = arith.constant dense<0.000000e+00> : vector<16x16xf32>
    %76 = tpu.matmul %72, %75, %cst_32 {dimension_numbers = #tpu.dot_dimension_numbers<[1], [0], [0], [1], [0, 0, 1, 1], [], []>} : vector<16x8xf32>, vector<8x16xf32>, vector<16x16xf32> -> vector<16x16xf32>
    %cst_33 = arith.constant 0.353553385 : f32
    %77 = vector.broadcast %cst_33 : f32 to vector<16x16xf32>
    %78 = arith.mulf %76, %77 : vector<16x16xf32>
    %79 = arith.addf %78, %1 : vector<16x16xf32>
    %cst_34 = arith.constant dense<0xFF800000> : vector<16xf32>
    %80 = vector.multi_reduction <maximumf>, %79, %cst_34 [1] : vector<16x16xf32> to vector<16xf32>
    %81 = vector.shape_cast %80 : vector<16xf32> to vector<16x1xf32>
    %82 = vector.broadcast %81 : vector<16x1xf32> to vector<16x16xf32>
    %83 = arith.subf %79, %82 : vector<16x16xf32>
    %84 = math.exp %83 : vector<16x16xf32>
    %cst_35 = arith.constant dense<0.000000e+00> : vector<16xf32>
    %85 = vector.multi_reduction <add>, %84, %cst_35 [1] : vector<16x16xf32> to vector<16xf32>
    %86 = vector.shape_cast %85 : vector<16xf32> to vector<16x1xf32>
    %87 = tpu.reciprocal %86 {approx = true} : vector<16x1xf32> -> vector<16x1xf32>
    %88 = arith.mulf %86, %87 : vector<16x1xf32>
    %cst_36 = arith.constant 2.000000e+00 : f32
    %89 = vector.broadcast %cst_36 : f32 to vector<16x1xf32>
    %90 = arith.subf %89, %88 : vector<16x1xf32>
    %91 = arith.mulf %87, %90 : vector<16x1xf32>
    %92 = vector.broadcast %91 : vector<16x1xf32> to vector<16x16xf32>
    %93 = arith.mulf %84, %92 : vector<16x16xf32>
    %cst_37 = arith.constant dense<0.000000e+00> : vector<16x8xf32>
    %94 = tpu.matmul %93, %74, %cst_37 {dimension_numbers = #tpu.dot_dimension_numbers<[1], [0], [0], [1], [0, 0, 1, 1], [], []>} : vector<16x16xf32>, vector<16x8xf32>, vector<16x8xf32> -> vector<16x8xf32>
    %95 = vector.extract_strided_slice %19 {offsets = [0, 24], sizes = [16, 8], strides = [1, 1]} : vector<16x32xf32> to vector<16x8xf32>
    %96 = vector.extract_strided_slice %22 {offsets = [0, 24], sizes = [16, 8], strides = [1, 1]} : vector<16x32xf32> to vector<16x8xf32>
    %97 = vector.extract_strided_slice %25 {offsets = [0, 24], sizes = [16, 8], strides = [1, 1]} : vector<16x32xf32> to vector<16x8xf32>
    %98 = tpu.transpose %96, [1, 0] : vector<16x8xf32> -> vector<8x16xf32>
    %cst_38 = arith.constant dense<0.000000e+00> : vector<16x16xf32>
    %99 = tpu.matmul %95, %98, %cst_38 {dimension_numbers = #tpu.dot_dimension_numbers<[1], [0], [0], [1], [0, 0, 1, 1], [], []>} : vector<16x8xf32>, vector<8x16xf32>, vector<16x16xf32> -> vector<16x16xf32>
    %cst_39 = arith.constant 0.353553385 : f32
    %100 = vector.broadcast %cst_39 : f32 to vector<16x16xf32>
    %101 = arith.mulf %99, %100 : vector<16x16xf32>
    %102 = arith.addf %101, %1 : vector<16x16xf32>
    %cst_40 = arith.constant dense<0xFF800000> : vector<16xf32>
    %103 = vector.multi_reduction <maximumf>, %102, %cst_40 [1] : vector<16x16xf32> to vector<16xf32>
    %104 = vector.shape_cast %103 : vector<16xf32> to vector<16x1xf32>
    %105 = vector.broadcast %104 : vector<16x1xf32> to vector<16x16xf32>
    %106 = arith.subf %102, %105 : vector<16x16xf32>
    %107 = math.exp %106 : vector<16x16xf32>
    %cst_41 = arith.constant dense<0.000000e+00> : vector<16xf32>
    %108 = vector.multi_reduction <add>, %107, %cst_41 [1] : vector<16x16xf32> to vector<16xf32>
    %109 = vector.shape_cast %108 : vector<16xf32> to vector<16x1xf32>
    %110 = tpu.reciprocal %109 {approx = true} : vector<16x1xf32> -> vector<16x1xf32>
    %111 = arith.mulf %109, %110 : vector<16x1xf32>
    %cst_42 = arith.constant 2.000000e+00 : f32
    %112 = vector.broadcast %cst_42 : f32 to vector<16x1xf32>
    %113 = arith.subf %112, %111 : vector<16x1xf32>
    %114 = arith.mulf %110, %113 : vector<16x1xf32>
    %115 = vector.broadcast %114 : vector<16x1xf32> to vector<16x16xf32>
    %116 = arith.mulf %107, %115 : vector<16x16xf32>
    %cst_43 = arith.constant dense<0.000000e+00> : vector<16x8xf32>
    %117 = tpu.matmul %116, %97, %cst_43 {dimension_numbers = #tpu.dot_dimension_numbers<[1], [0], [0], [1], [0, 0, 1, 1], [], []>} : vector<16x16xf32>, vector<16x8xf32>, vector<16x8xf32> -> vector<16x8xf32>
    %118 = tpu.concatenate %48, %71, %94, %117 in 1 : vector<16x8xf32>, vector<16x8xf32>, vector<16x8xf32>, vector<16x8xf32> -> vector<16x32xf32>
    %cst_44 = arith.constant dense<0.000000e+00> : vector<16x32xf32>
    %119 = tpu.matmul %118, %3, %cst_44 {dimension_numbers = #tpu.dot_dimension_numbers<[1], [0], [0], [1], [0, 0, 1, 1], [], []>} : vector<16x32xf32>, vector<32x32xf32>, vector<16x32xf32> -> vector<16x32xf32>
    %120 = vector.broadcast %9 : vector<1x32xf32> to vector<16x32xf32>
    %121 = arith.addf %119, %120 : vector<16x32xf32>
    %122 = arith.addf %0, %121 : vector<16x32xf32>
    %cst_45 = arith.constant dense<0.000000e+00> : vector<16xf32>
    %123 = vector.multi_reduction <add>, %122, %cst_45 [1] : vector<16x32xf32> to vector<16xf32>
    %124 = vector.shape_cast %123 : vector<16xf32> to vector<16x1xf32>
    %cst_46 = arith.constant 3.200000e+01 : f32
    %125 = vector.broadcast %cst_46 : f32 to vector<16x1xf32>
    %126 = arith.divf %124, %125 : vector<16x1xf32>
    %127 = vector.broadcast %126 : vector<16x1xf32> to vector<16x32xf32>
    %128 = arith.subf %122, %127 : vector<16x32xf32>
    %129 = arith.mulf %128, %128 : vector<16x32xf32>
    %cst_47 = arith.constant dense<0.000000e+00> : vector<16xf32>
    %130 = vector.multi_reduction <add>, %129, %cst_47 [1] : vector<16x32xf32> to vector<16xf32>
    %131 = vector.shape_cast %130 : vector<16xf32> to vector<16x1xf32>
    %cst_48 = arith.constant 3.200000e+01 : f32
    %132 = vector.broadcast %cst_48 : f32 to vector<16x1xf32>
    %133 = arith.divf %131, %132 : vector<16x1xf32>
    %134 = vector.broadcast %126 : vector<16x1xf32> to vector<16x32xf32>
    %135 = arith.subf %122, %134 : vector<16x32xf32>
    %cst_49 = arith.constant 9.99999974E-6 : f32
    %136 = vector.broadcast %cst_49 : f32 to vector<16x1xf32>
    %137 = arith.addf %133, %136 : vector<16x1xf32>
    %138 = math.rsqrt %137 : vector<16x1xf32>
    %139 = vector.broadcast %138 : vector<16x1xf32> to vector<16x32xf32>
    %140 = arith.mulf %135, %139 : vector<16x32xf32>
    %141 = vector.broadcast %12 : vector<1x32xf32> to vector<16x32xf32>
    %142 = arith.mulf %140, %141 : vector<16x32xf32>
    %143 = vector.broadcast %13 : vector<1x32xf32> to vector<16x32xf32>
    %144 = arith.addf %142, %143 : vector<16x32xf32>
    %cst_50 = arith.constant dense<0.000000e+00> : vector<16x64xf32>
    %145 = tpu.matmul %144, %4, %cst_50 {dimension_numbers = #tpu.dot_dimension_numbers<[1], [0], [0], [1], [0, 0, 1, 1], [], []>} : vector<16x32xf32>, vector<32x64xf32>, vector<16x64xf32> -> vector<16x64xf32>
    %146 = vector.broadcast %10 : vector<1x64xf32> to vector<16x64xf32>
    %147 = arith.addf %145, %146 : vector<16x64xf32>
    %cst_51 = arith.constant 0.000000e+00 : f32
    %148 = vector.broadcast %cst_51 : f32 to vector<16x64xf32>
    %149 = arith.maximumf %147, %148 : vector<16x64xf32>
    %cst_52 = arith.constant dense<0.000000e+00> : vector<16x32xf32>
    %150 = tpu.matmul %149, %5, %cst_52 {dimension_numbers = #tpu.dot_dimension_numbers<[1], [0], [0], [1], [0, 0, 1, 1], [], []>} : vector<16x64xf32>, vector<64x32xf32>, vector<16x32xf32> -> vector<16x32xf32>
    %151 = vector.broadcast %11 : vector<1x32xf32> to vector<16x32xf32>
    %152 = arith.addf %150, %151 : vector<16x32xf32>
    %153 = arith.addf %144, %152 : vector<16x32xf32>
    %cst_53 = arith.constant dense<0.000000e+00> : vector<16xf32>
    %154 = vector.multi_reduction <add>, %153, %cst_53 [1] : vector<16x32xf32> to vector<16xf32>
    %155 = vector.shape_cast %154 : vector<16xf32> to vector<16x1xf32>
    %cst_54 = arith.constant 3.200000e+01 : f32
    %156 = vector.broadcast %cst_54 : f32 to vector<16x1xf32>
    %157 = arith.divf %155, %156 : vector<16x1xf32>
    %158 = vector.broadcast %157 : vector<16x1xf32> to vector<16x32xf32>
    %159 = arith.subf %153, %158 : vector<16x32xf32>
    %160 = arith.mulf %159, %159 : vector<16x32xf32>
    %cst_55 = arith.constant dense<0.000000e+00> : vector<16xf32>
    %161 = vector.multi_reduction <add>, %160, %cst_55 [1] : vector<16x32xf32> to vector<16xf32>
    %162 = vector.shape_cast %161 : vector<16xf32> to vector<16x1xf32>
    %cst_56 = arith.constant 3.200000e+01 : f32
    %163 = vector.broadcast %cst_56 : f32 to vector<16x1xf32>
    %164 = arith.divf %162, %163 : vector<16x1xf32>
    %165 = vector.broadcast %157 : vector<16x1xf32> to vector<16x32xf32>
    %166 = arith.subf %153, %165 : vector<16x32xf32>
    %cst_57 = arith.constant 9.99999974E-6 : f32
    %167 = vector.broadcast %cst_57 : f32 to vector<16x1xf32>
    %168 = arith.addf %164, %167 : vector<16x1xf32>
    %169 = math.rsqrt %168 : vector<16x1xf32>
    %170 = vector.broadcast %169 : vector<16x1xf32> to vector<16x32xf32>
    %171 = arith.mulf %166, %170 : vector<16x32xf32>
    %172 = vector.broadcast %14 : vector<1x32xf32> to vector<16x32xf32>
    %173 = arith.mulf %171, %172 : vector<16x32xf32>
    %174 = vector.broadcast %15 : vector<1x32xf32> to vector<16x32xf32>
    %175 = arith.addf %173, %174 : vector<16x32xf32>
    %c0_58 = arith.constant 0 : index
    %c0_59 = arith.constant 0 : index
    %176 = vector.load %arg5[%c0_58, %c0_59] : memref<16x32xf32, #tpu.memory_space<vmem>>, vector<16x32xf32>
    tpu.vector_store %arg5[%c0_58, %c0_59], %175 {strides = array<i32>} : memref<16x32xf32, #tpu.memory_space<vmem>>, vector<16x32xf32>,
    return
  }
}

</mosaic_0001>

<bundles_post_ra>
// kernel: tpu_custom_call.1
= control target key start
LH: loop header
LB: loop body
LE: loop exit
PB: predicated region body
PF: predicated region fallthrough
CT: control target
= control target key end

     0   :  { %vm51_vm0 = vcmask 261120   ;;  %s955_s30 = smov 32   ;;  %s1252_s0 = inlined_call_operand.vmem [shape: f32[16,32], index: 0, kind: input, shape index: {}]   ;;  %s1253_s1 = inlined_call_operand.vmem [shape: f32[16,16], index: 1, kind: input, shape index: {}]   ;;  %s1254_s2 = inlined_call_operand.vmem [shape: f32[32,128], index: 2, kind: input, shape index: {}]   ;;  %s1255_s3 = inlined_call_operand.vmem [shape: f32[96,64], index: 3, kind: input, shape index: {}]   ;;  %s1256_s4 = inlined_call_operand.vmem [shape: f32[10,64], index: 4, kind: input, shape index: {}]   ;;  %s1257_s5 = inlined_call_operand.hbm [shape: f32[16,32], index: 5, kind: output, shape index: {}]  }
   0x1   :  { %v1006_v0 = vld [vmem:[%s1254_s2 + $0x18] sm:$0xff]  ;;  %v1011_v1 = vld [vmem:[%s1254_s2 + $0x10] sm:$0xff]  ;;  %v1019_v3 = vld [vmem:[%s1254_s2 + $0x8] sm:$0xff] }
   0x2   :  { %70 = vmatpush.msra.mxu0 %v1006_v0  ;;  %v867_v2 = vpack.i.bf16 %v1011_v1, %v1006_v0  ;;  %v1024_v4 = vld [vmem:[%s1254_s2] sm:$0xff] }
   0x3   :  { %v872_v5 = vpack.i.bf16 %v1024_v4, %v1019_v3  ;;  %v877_v6 = vld [vmem:[%s1256_s4 + $0x1] ss:$0 sm:$0xff] }
   0x4   :  { %71 = vmatpush.msra.mxu0 %v1011_v1  ;;  %v1035_v7 = vld [vmem:[%s1252_s0] sm:$0xff]  ;;  %86 = vrot.lane.b32.xlu0 %v877_v6, %s955_s30 }
   0x6   :  { %72 = vmatpush.msra.mxu0 %v1019_v3 }
   0x7   :  { %10 = vsyncpa [#allocation3], 0  ;;  %v1045_v8 = vld [vmem:[%s1252_s0 + $0x8] sm:$0xff]  ;;  %s956_s7 = smov 88   ;;  %s957_s8 = smov 96   ;;  %vm104_vm1 = vcmask 64512  }
   0x8   :  { %73 = vmatpush.msra.mxu0 %v1024_v4  ;;  %v878_v12 = vld [vmem:[%s1256_s4] ss:$0 sm:$0xff]  ;;  %s958_s0 = smov 120   ;;  %s959_s11 = smov 72   ;;  %vm142_vm2 = vcmask 130048   ;;  %v24_v40 = vld [vmem:[%s1253_s1 + $0x8] sm:$0xff] }
   0x9   :  { %797 = vmatmul.msk.f32.vlgmr.msra.gmra.mxu0 %vm51_vm0, %v1035_v7  ;;  %s960_s12 = smov 80   ;;  %s961_s13 = smov 104   ;;  %v23_v32 = vld [vmem:[%s1253_s1] sm:$0xff]  ;;  %vm554_vm3 = vcmask 195584   ;;  %vm695_vm11 = vcmask 523264  }
   0xa   :  { %s962_s14 = smov 112   ;;  %v879_v61 = vld [vmem:[%s1256_s4 + $0x2] ss:$0 sm:$0xff]  ;;  %s963_s20 = smov 64  }
   0xb   :  { %s964_s21 = smov 40   ;;  %s965_s22 = smov 56  }
   0xc   :  { %s966_s23 = smov 48   ;;  %s967_s24 = smov 8  }
   0xd   :  { %s968_s25 = smov 16   ;;  %s969_s26 = smov 24  }
  0x11   :  { %798 = vmatmul.msk.f32.gmra.mxu0 %vm51_vm0, %v1045_v8 }
  0x76   :  { %v87_v9 = vpop.permute.xlu0 %86 }
  0x86   :  { %v1049_v10 = vpop.f32.mrf.mxu0 }
  0x87   :  { %v89_v11 = vadd.f32 %v87_v9, %v1049_v10  ;;  %v82_v14 = vadd.f32 %v878_v12, %v1049_v10 }
  0x89   :  { %212 = vrot.lane.b32.xlu2 %v89_v11, %s956_s7  ;;  %100 = vrot.lane.b32.xlu1 %v89_v11, %s957_s8 }
  0x8e   :  { %v1055_v13 = vpop.f32.mrf.mxu0 }
  0x8f   :  { %v90_v15 = vadd.f32 %v87_v9, %v1055_v13  ;;  %v83_v16 = vadd.f32 %v878_v12, %v1055_v13 }
  0x91   :  { %208 = vrot.lane.b32.xlu2 %v82_v14, %s958_s0  ;;  %214 = vrot.lane.b32.xlu1 %v90_v15, %s956_s7 }
  0x92   :  { %102 = vrot.lane.b32.xlu0 %v90_v15, %s957_s8 }
  0x99   :  { %424 = vrot.lane.b32.xlu2 %v89_v11, %s959_s11  ;;  %426 = vrot.lane.b32.xlu1 %v90_v15, %s959_s11 }
  0x9a   :  { %210 = vrot.lane.b32.xlu0 %v83_v16, %s958_s0 }
  0xa1   :  { %318 = vrot.lane.b32.xlu2 %v89_v11, %s960_s12  ;;  %320 = vrot.lane.b32.xlu1 %v90_v15, %s960_s12  ;;  %s785_s12 = sshll.u32 %s1257_s5, 4  ;;  %s786_s12 = int_to_ptr.hbm [resolvable:$true] %s785_s12 }
  0xa2   :  { %420 = vrot.lane.b32.xlu0 %v82_v14, %s961_s13 }
  0xa9   :  { %314 = vrot.lane.b32.xlu1 %v82_v14, %s962_s14  ;;  %316 = vrot.lane.b32.xlu2 %v83_v16, %s962_s14  ;;  %s972_s14 = smov 128  }
  0xaa   :  { %422 = vrot.lane.b32.xlu0 %v83_v16, %s961_s13 }
  0xe3   :  { %v213_v17 = vpop.permute.xlu2 %212 }
  0xeb   :  { %v209_v19 = vpop.permute.xlu2 %208 }
  0xf3   :  { %v425_v23 = vpop.permute.xlu2 %424 }
  0xfb   :  { %v101_v18 = vpop.permute.xlu1 %100  ;;  %v319_v26 = vpop.permute.xlu2 %318 }
 0x103   :  { %v215_v20 = vpop.permute.xlu1 %214  ;;  %v317_v30 = vpop.permute.xlu2 %316 }
 0x104   :  { %v103_v21 = vpop.permute.xlu0 %102  ;;  %805 = vmatpush.xpose.msk.msra.mxu3 %vm104_vm1, %v215_v20 }
 0x105   :  { %799 = vmatpush.xpose.msk.msra.mxu1 %vm104_vm1, %v103_v21 }
 0x108   :  { %806 = vmatpush.xpose.msk.msra.mxu3 %vm104_vm1, %v213_v17 }
 0x109   :  { %800 = vmatpush.xpose.msk.msra.mxu1 %vm104_vm1, %v101_v18 }
 0x10b   :  { %807 = vmatmul.msk.f32.vlgmr.msra.gmra.mxu3 %vm104_vm1, %v209_v19  ;;  %v427_v22 = vpop.permute.xlu1 %426 }
 0x10c   :  { %801 = vmatmul.msk.f32.vlgmr.msra.gmra.mxu1 %vm104_vm1, %v82_v14  ;;  %817 = vmatpush.xpose.msk.msrb.mxu3 %vm104_vm1, %v427_v22  ;;  %v211_v24 = vpop.permute.xlu0 %210 }
 0x110   :  { %818 = vmatpush.xpose.msk.msrb.mxu3 %vm104_vm1, %v425_v23 }
 0x113   :  { %v321_v25 = vpop.permute.xlu1 %320  ;;  %808 = vmatmul.msk.f32.gmra.mxu3 %vm104_vm1, %v211_v24 }
 0x114   :  { %802 = vmatmul.msk.f32.gmra.mxu1 %vm104_vm1, %v83_v16  ;;  %811 = vmatpush.xpose.msk.msrb.mxu0 %vm104_vm1, %v321_v25  ;;  %v421_v27 = vpop.permute.xlu0 %420 }
 0x118   :  { %812 = vmatpush.xpose.msk.msrb.mxu0 %vm104_vm1, %v319_v26 }
 0x11b   :  { %v315_v28 = vpop.permute.xlu1 %314  ;;  %819 = vmatmul.msk.f32.vlgmr.msrb.gmra.mxu3 %vm104_vm1, %v421_v27 }
 0x11c   :  { %813 = vmatmul.msk.f32.vlgmr.msrb.gmra.mxu0 %vm104_vm1, %v315_v28  ;;  %v423_v29 = vpop.permute.xlu0 %422 }
 0x123   :  { %820 = vmatmul.msk.f32.gmra.mxu3 %vm104_vm1, %v423_v29 }
 0x124   :  { %814 = vmatmul.msk.f32.gmra.mxu0 %vm104_vm1, %v317_v30 }
 0x189   :  { %v132_v31 = vpop.f32.mrf.mxu1 }
 0x18a   :  { %v138_v33 = vmul.f32 0.35355338, %v132_v31 }
 0x18c   :  { %v140_v34 = vadd.f32 %v138_v33, %v23_v32 }
 0x18e   :  { %v241_v35 = vpop.f32.mrf.mxu3  ;;  %v143_v36 = vsel %vm142_vm2, %v140_v34, -inf }
 0x18f   :  { %v247_v37 = vmul.f32 0.35355338, %v241_v35  ;;  %144 = vmax.xlane.f32.xlu0 %v143_v36 }
 0x191   :  { %v135_v38 = vpop.f32.mrf.mxu1  ;;  %v249_v39 = vadd.f32 %v247_v37, %v23_v32 }
 0x192   :  { %v139_v41 = vmul.f32 0.35355338, %v135_v38 }
 0x193   :  { %v251_v42 = vsel %vm142_vm2, %v249_v39, -inf }
 0x194   :  { %252 = vmax.xlane.f32.xlu2 %v251_v42  ;;  %v141_v43 = vadd.f32 %v139_v41, %v24_v40 }
 0x196   :  { %v244_v44 = vpop.f32.mrf.mxu3  ;;  %v146_v45 = vsel %vm142_vm2, %v141_v43, -inf }
 0x197   :  { %147 = vmax.xlane.f32.xlu1 %v146_v45  ;;  %v248_v57 = vmul.f32 0.35355338, %v244_v44 }
 0x199   :  { %v347_v46 = vpop.f32.mrf.mxu0  ;;  %v250_v63 = vadd.f32 %v248_v57, %v24_v40 }
 0x19a   :  { %v353_v47 = vmul.f32 0.35355338, %v347_v46 }
 0x19b   :  { %v254_v9 = vsel %vm142_vm2, %v250_v63, -inf }
 0x19c   :  { %v355_v48 = vadd.f32 %v353_v47, %v23_v32 }
 0x19e   :  { %v453_v49 = vpop.f32.mrf.mxu3  ;;  %v357_v50 = vsel %vm142_vm2, %v355_v48, -inf }
 0x19f   :  { %v459_v51 = vmul.f32 0.35355338, %v453_v49  ;;  %358 = vmax.xlane.f32.xlu0 %v357_v50 }
 0x1a1   :  { %v350_v52 = vpop.f32.mrf.mxu0  ;;  %v1086_v53 = vadd.f32 %v459_v51, %v23_v32 }
 0x1a2   :  { %v354_v54 = vmul.f32 0.35355338, %v350_v52 }
 0x1a3   :  { %v463_v55 = vsel %vm142_vm2, %v1086_v53, -inf }
 0x1a4   :  { %464 = vmax.xlane.f32.xlu1 %v463_v55  ;;  %v356_v56 = vadd.f32 %v354_v54, %v24_v40 }
 0x1a6   :  { %v456_v58 = vpop.f32.mrf.mxu3  ;;  %v360_v59 = vsel %vm142_vm2, %v356_v56, -inf }
 0x1a7   :  { %v460_v60 = vmul.f32 0.35355338, %v456_v58  ;;  %361 = vmax.xlane.f32.xlu0 %v360_v59 }
 0x1a9   :  { %v1094_v62 = vadd.f32 %v460_v60, %v24_v40 }
 0x1ab   :  { %v466_v6 = vsel %vm142_vm2, %v1094_v62, -inf }
 0x1ac   :  { %467 = vmax.xlane.f32.xlu1 %v466_v6  ;;  %93 = vrot.lane.b32.xlu2 %v879_v61, %s963_s20 }
 0x1af   :  { %255 = vmax.xlane.f32.xlu0 %v254_v9 }
 0x202   :  { %v145_v11 = vpop.xlane.xlu0 %144 }
 0x203   :  { %v149_v12 = vsub.f32 %v140_v34, %v145_v11 }
 0x205   :  { %v151_v14 = vmul.f32 1.442695, %v149_v12 }
 0x207   :  { %887 = vpow2.f32 %v151_v14  ;;  %v253_v15 = vpop.xlane.xlu2 %252 }
 0x208   :  { %v257_v16 = vsub.f32 %v249_v39, %v253_v15 }
 0x20a   :  { %v259_v17 = vmul.f32 1.442695, %v257_v16  ;;  %v148_v18 = vpop.xlane.xlu1 %147 }
 0x20b   :  { %v150_v19 = vsub.f32 %v141_v43, %v148_v18 }
 0x20c   :  { %889 = vpow2.f32 %v259_v17 }
 0x20d   :  { %v1099_v20 = vpop.eup %887  ;;  %v153_v21 = vmul.f32 1.442695, %v150_v19 }
 0x20e   :  { %v155_v22 = vsel %vm142_vm2, %v1099_v20, 0.0 }
 0x20f   :  { %891 = vpow2.f32 %v153_v21  ;;  %156 = vadd.xlane.f32.xlu1 %v155_v22  ;;  %v94_v23 = vpop.permute.xlu2 %93 }
 0x210   :  { %v96_v24 = vadd.f32 %v94_v23, %v1049_v10  ;;  %v97_v25 = vadd.f32 %v94_v23, %v1055_v13 }
 0x212   :  { %v359_v26 = vpop.xlane.xlu0 %358  ;;  %v847_v27 = vpack.i.bf16 %v96_v24, %v97_v25  ;;  %v1105_v28 = vpop.eup %889 }
 0x213   :  { %v363_v29 = vsub.f32 %v355_v48, %v359_v26  ;;  %v263_v32 = vsel %vm142_vm2, %v1105_v28, 0.0 }
 0x214   :  { %848 = vrot.lane.b32.xlu0 %v847_v27, %s963_s20 }
 0x215   :  { %v1107_v30 = vpop.eup %891  ;;  %v365_v31 = vmul.f32 1.442695, %v363_v29 }
 0x216   :  { %v158_v33 = vsel %vm142_vm2, %v1107_v30, 0.0 }
 0x217   :  { %893 = vpow2.f32 %v365_v31  ;;  %264 = vadd.xlane.f32.xlu1 %v263_v32  ;;  %159 = vadd.xlane.f32.xlu2 %v158_v33  ;;  %v465_v42 = vpop.xlane.xlu1 %464 }
 0x218   :  { %v469_v43 = vsub.f32 %v1086_v53, %v465_v42 }
 0x21a   :  { %v362_v10 = vpop.xlane.xlu0 %361  ;;  %v471_v46 = vmul.f32 1.442695, %v469_v43 }
 0x21b   :  { %v364_v13 = vsub.f32 %v356_v56, %v362_v10 }
 0x21d   :  { %v1113_v34 = vpop.eup %893  ;;  %v367_v35 = vmul.f32 1.442695, %v364_v13 }
 0x21e   :  { %v369_v36 = vsel %vm142_vm2, %v1113_v34, 0.0 }
 0x21f   :  { %895 = vpow2.f32 %v367_v35  ;;  %370 = vadd.xlane.f32.xlu2 %v369_v36  ;;  %v468_v49 = vpop.xlane.xlu1 %467 }
 0x220   :  { %v470_v50 = vsub.f32 %v1094_v62, %v468_v49 }
 0x222   :  { %v256_v37 = vpop.xlane.xlu0 %255  ;;  %v473_v51 = vmul.f32 1.442695, %v470_v50 }
 0x223   :  { %v258_v38 = vsub.f32 %v250_v63, %v256_v37 }
 0x225   :  { %v1117_v39 = vpop.eup %895  ;;  %v261_v40 = vmul.f32 1.442695, %v258_v38 }
 0x226   :  { %v372_v41 = vsel %vm142_vm2, %v1117_v39, 0.0 }
 0x227   :  { %897 = vpow2.f32 %v261_v40  ;;  %373 = vadd.xlane.f32.xlu2 %v372_v41 }
 0x228   :  { %899 = vpow2.f32 %v471_v46 }
 0x229   :  { %901 = vpow2.f32 %v473_v51 }
 0x22d   :  { %v1122_v44 = vpop.eup %897 }
 0x22e   :  { %v266_v45 = vsel %vm142_vm2, %v1122_v44, 0.0  ;;  %v1126_v47 = vpop.eup %899 }
 0x22f   :  { %267 = vadd.xlane.f32.xlu1 %v266_v45  ;;  %v475_v48 = vsel %vm142_vm2, %v1126_v47, 0.0  ;;  %v1135_v52 = vpop.eup %901 }
 0x230   :  { %v478_v53 = vsel %vm142_vm2, %v1135_v52, 0.0 }
 0x23e   :  { %476 = vadd.xlane.f32.xlu0 %v475_v48 }
 0x23f   :  { %858 = vrot.lane.b32.xlu2 %v847_v27, %s964_s21 }
 0x247   :  { %868 = vrot.lane.b32.xlu2 %v867_v2, %s955_s30 }
 0x248   :  { %853 = vrot.lane.b32.xlu1 %v847_v27, %s965_s22 }
 0x252   :  { %863 = vrot.lane.b32.xlu0 %v847_v27, %s966_s23 }
 0x272   :  { %479 = vadd.xlane.f32.xlu1 %v478_v53 }
 0x282   :  { %v157_v54 = vpop.xlane.xlu1 %156 }
 0x283   :  { %903 = vrcp.f32 %v157_v54 }
 0x286   :  { %v849_v55 = vpop.permute.xlu0 %848 }
 0x287   :  { %v850_v0 = vunpack.i.l.bf16 %v849_v55  ;;  %v851_v2 = vunpack.i.h.bf16 %v849_v55 }
 0x289   :  { %v904_v1 = vpop.eup %903  ;;  %199 = vmatpush.msra.mxu2 %v850_v0 }
 0x28a   :  { %v163_v56 = vmul.f32 %v904_v1, %v157_v54  ;;  %v160_v57 = vpop.xlane.xlu2 %159  ;;  %v265_v11 = vpop.xlane.xlu1 %264 }
 0x28b   :  { %905 = vrcp.f32 %v160_v57  ;;  %200 = vmatpush.msra.mxu2 %v851_v2  ;;  %873 = vrot.lane.b32.xlu1 %v872_v5, %s955_s30 }
 0x28c   :  { %v165_v58 = vsub.f32 2.0, %v163_v56  ;;  %907 = vrcp.f32 %v265_v11 }
 0x28e   :  { %v167_v59 = vmul.f32 %v904_v1, %v165_v58 }
 0x290   :  { %v169_v60 = vmul.f32 %v1099_v20, %v167_v59 }
 0x291   :  { %v906_v61 = vpop.eup %905 }
 0x292   :  { %v164_v62 = vmul.f32 %v906_v61, %v160_v57  ;;  %803 = vmatmul.msk.f32.vlgmr.msra.gmra.mxu2 %vm142_vm2, %v169_v60  ;;  %v371_v12 = vpop.xlane.xlu2 %370  ;;  %v908_v3 = vpop.eup %907 }
 0x293   :  { %v271_v4 = vmul.f32 %v908_v3, %v265_v11 }
 0x294   :  { %v166_v63 = vsub.f32 2.0, %v164_v62 }
 0x295   :  { %v273_v15 = vsub.f32 2.0, %v271_v4 }
 0x296   :  { %v168_v6 = vmul.f32 %v906_v61, %v166_v63 }
 0x297   :  { %v275_v19 = vmul.f32 %v908_v3, %v273_v15 }
 0x298   :  { %v170_v9 = vmul.f32 %v1107_v30, %v168_v6 }
 0x299   :  { %v277_v26 = vmul.f32 %v1105_v28, %v275_v19 }
 0x29a   :  { %804 = vmatmul.msk.f32.gmra.mxu2 %vm142_vm2, %v170_v9  ;;  %v374_v5 = vpop.xlane.xlu2 %373 }
 0x2a2   :  { %v268_v14 = vpop.xlane.xlu1 %267  ;;  %v859_v24 = vpop.permute.xlu2 %858 }
 0x2a3   :  { %909 = vrcp.f32 %v268_v14  ;;  %v860_v30 = vunpack.i.l.bf16 %v859_v24  ;;  %v861_v33 = vunpack.i.h.bf16 %v859_v24 }
 0x2a4   :  { %911 = vrcp.f32 %v371_v12 }
 0x2a9   :  { %v910_v17 = vpop.eup %909 }
 0x2aa   :  { %v912_v18 = vpop.eup %911  ;;  %v272_v20 = vmul.f32 %v910_v17, %v268_v14  ;;  %v869_v56 = vpop.permute.xlu2 %868 }
 0x2ab   :  { %v377_v23 = vmul.f32 %v912_v18, %v371_v12  ;;  %v871_v57 = vunpack.i.h.bf16 %v869_v56 }
 0x2ac   :  { %v274_v27 = vsub.f32 2.0, %v272_v20 }
 0x2ad   :  { %v379_v31 = vsub.f32 2.0, %v377_v23 }
 0x2ae   :  { %v276_v10 = vmul.f32 %v910_v17, %v274_v27  ;;  %v970_v27 = vmov 32.0  }
 0x2af   :  { %v381_v35 = vmul.f32 %v912_v18, %v379_v31  ;;  %v880_v18 = vld [vmem:[%s1256_s4 + $0x3] ss:$0 sm:$0xff] }
 0x2b0   :  { %v278_v28 = vmul.f32 %v1122_v44, %v276_v10 }
 0x2b1   :  { %v477_v16 = vpop.xlane.xlu0 %476  ;;  %v383_v42 = vmul.f32 %v1113_v34, %v381_v35 }
 0x2b2   :  { %913 = vrcp.f32 %v477_v16 }
 0x2b3   :  { %915 = vrcp.f32 %v374_v5 }
 0x2b8   :  { %v914_v29 = vpop.eup %913 }
 0x2b9   :  { %v916_v32 = vpop.eup %915  ;;  %v483_v13 = vmul.f32 %v914_v29, %v477_v16 }
 0x2ba   :  { %v854_v21 = vpop.permute.xlu1 %853  ;;  %v378_v36 = vmul.f32 %v916_v32, %v374_v5 }
 0x2bb   :  { %v855_v22 = vunpack.i.l.bf16 %v854_v21  ;;  %v856_v25 = vunpack.i.h.bf16 %v854_v21  ;;  %v485_v40 = vsub.f32 2.0, %v483_v13 }
 0x2bc   :  { %v380_v43 = vsub.f32 2.0, %v378_v36 }
 0x2bd   :  { %305 = vmatpush.msrb.mxu2 %v855_v22  ;;  %v487_v45 = vmul.f32 %v914_v29, %v485_v40 }
 0x2be   :  { %v382_v46 = vmul.f32 %v916_v32, %v380_v43  ;;  %v31_v43 = vld [vmem:[%s1255_s3 + $0x10] sm:$0xff] }
 0x2bf   :  { %306 = vmatpush.msrb.mxu2 %v856_v25  ;;  %v489_v48 = vmul.f32 %v1126_v47, %v487_v45  ;;  %v30_v45 = vld [vmem:[%s1255_s3 + $0x8] sm:$0xff] }
 0x2c0   :  { %809 = vmatmul.msk.f32.vlgmr.msrb.gmra.mxu2 %vm142_vm2, %v277_v26  ;;  %v384_v49 = vmul.f32 %v1117_v39, %v382_v46  ;;  %v29_v46 = vld [vmem:[%s1255_s3] sm:$0xff] }
 0x2c1   :  { %517 = vmatpush.msra.mxu2 %v860_v30 }
 0x2c3   :  { %518 = vmatpush.msra.mxu2 %v861_v33 }
 0x2c4   :  { %v864_v37 = vpop.permute.xlu0 %863 }
 0x2c5   :  { %v865_v38 = vunpack.i.l.bf16 %v864_v37  ;;  %v866_v41 = vunpack.i.h.bf16 %v864_v37 }
 0x2c7   :  { %411 = vmatpush.msrb.mxu1 %v865_v38 }
 0x2c8   :  { %810 = vmatmul.msk.f32.gmra.mxu2 %vm142_vm2, %v278_v28 }
 0x2c9   :  { %412 = vmatpush.msrb.mxu1 %v866_v41 }
 0x2ca   :  { %815 = vmatmul.msk.f32.vlgmr.msrb.gmra.mxu1 %vm142_vm2, %v383_v42  ;;  %v32_v42 = vld [vmem:[%s1255_s3 + $0x18] sm:$0xff] }
 0x2cb   :  { %681 = vmatpush.msra.mxu1 %v32_v42 }
 0x2cd   :  { %682 = vmatpush.msra.mxu1 %v31_v43 }
 0x2cf   :  { %683 = vmatpush.msra.mxu1 %v30_v45 }
 0x2d0   :  { %821 = vmatmul.msk.f32.vlgmr.msra.gmra.mxu2 %vm142_vm2, %v489_v48 }
 0x2d1   :  { %684 = vmatpush.msra.mxu1 %v29_v46 }
 0x2d2   :  { %816 = vmatmul.msk.f32.gmra.mxu1 %vm142_vm2, %v384_v49 }
 0x2e5   :  { %v480_v44 = vpop.xlane.xlu1 %479 }
 0x2e6   :  { %917 = vrcp.f32 %v480_v44 }
 0x2e7   :  { %919 = vrcp.f32 %v970_v27  ;;  %v884_v27 = vld [vmem:[%s1256_s4 + $0x5] ss:$0 sm:$0xff] }
 0x2ec   :  { %v918_v50 = vpop.eup %917 }
 0x2ed   :  { %v484_v34 = vmul.f32 %v918_v50, %v480_v44  ;;  %v920_v29 = vpop.eup %919 }
 0x2ee   :  { %v612_v30 = vmul.f32 32.0, %v920_v29  ;;  %vm616_vm4 = vweird.f32 %v920_v29 }
 0x2ef   :  { %v486_v51 = vsub.f32 2.0, %v484_v34  ;;  %v39_v34 = vld [vmem:[%s1255_s3 + $0x50] sm:$0xff] }
 0x2f0   :  { %v613_v31 = vsub.f32 1.0, %v612_v30 }
 0x2f1   :  { %v488_v53 = vmul.f32 %v918_v50, %v486_v51  ;;  %v40_v50 = vld [vmem:[%s1255_s3 + $0x58] sm:$0xff] }
 0x2f2   :  { %v614_v32 = vmul.f32 %v920_v29, %v613_v31  ;;  %710 = vmatpush.msra.mxu3 %v40_v50 }
 0x2f3   :  { %v490_v54 = vmul.f32 %v1135_v52, %v488_v53  ;;  %v870_v52 = vunpack.i.l.bf16 %v869_v56  ;;  %v36_v56 = vld [vmem:[%s1255_s3 + $0x38] sm:$0xff] }
 0x2f4   :  { %v615_v33 = vadd.f32 %v920_v29, %v614_v32  ;;  %711 = vmatpush.msra.mxu3 %v39_v34 }
 0x2f5   :  { %822 = vmatmul.msk.f32.gmra.mxu2 %vm142_vm2, %v490_v54  ;;  %592 = vmatpush.msra.mxu0 %v870_v52  ;;  %v38_v54 = vld [vmem:[%s1255_s3 + $0x48] sm:$0xff] }
 0x2f6   :  { %v1174_v10 = vsel %vm616_vm4, %v920_v29, %v615_v33  ;;  %712 = vmatpush.msra.mxu3 %v38_v54 }
 0x2f7   :  { %593 = vmatpush.msra.mxu0 %v871_v57 }
 0x2fd   :  { %v874_v60 = vpop.permute.xlu1 %873 }
 0x2fe   :  { %v876_v61 = vunpack.i.h.bf16 %v874_v60  ;;  %v875_v62 = vunpack.i.l.bf16 %v874_v60 }
 0x300   :  { %594 = vmatpush.msra.mxu0 %v875_v62 }
 0x302   :  { %595 = vmatpush.msra.mxu0 %v876_v61  ;;  %v882_v61 = vld [vmem:[%s1256_s4 + $0x7] ss:$0 sm:$0xff] }
 0x315   :  { %v202_v55 = vpop.f32.mrf.mxu2 }
 0x31d   :  { %v205_v0 = vpop.f32.mrf.mxu2 }
 0x343   :  { %v308_v1 = vpop.f32.mrf.mxu2 }
 0x344   :  { %528 = vrot.lane.b32.xlu0 %v308_v1, %s967_s24 }
 0x347   :  { %v414_v47 = vpop.f32.mrf.mxu1 }
 0x348   :  { %536 = vrot.lane.b32.xlu2 %v414_v47, %s968_s25  ;;  %v37_v47 = vld [vmem:[%s1255_s3 + $0x40] sm:$0xff] }
 0x349   :  { %713 = vmatpush.msra.mxu3 %v37_v47  ;;  %v885_v47 = vld [vmem:[%s1256_s4 + $0x8] ss:$0 sm:$0xff] }
 0x34b   :  { %v311_v39 = vpop.f32.mrf.mxu2  ;;  %714 = vmatpush.msra.mxu3 %v36_v56  ;;  %v886_v56 = vld [vmem:[%s1256_s4 + $0x9] ss:$0 sm:$0xff] }
 0x34f   :  { %v417_v58 = vpop.f32.mrf.mxu1 }
 0x350   :  { %530 = vrot.lane.b32.xlu2 %v311_v39, %s967_s24 }
 0x353   :  { %v520_v2 = vpop.f32.mrf.mxu2 }
 0x354   :  { %544 = vrot.lane.b32.xlu0 %v520_v2, %s969_s26 }
 0x35c   :  { %538 = vrot.lane.b32.xlu0 %v417_v58, %s968_s25  ;;  %v881_v58 = vld [vmem:[%s1256_s4 + $0x6] ss:$0 sm:$0xff] }
 0x378   :  { %v523_v59 = vpop.f32.mrf.mxu2 }
 0x379   :  { %546 = vrot.lane.b32.xlu2 %v523_v59, %s969_s26 }
 0x3a2   :  { %v537_v6 = vpop.permute.xlu2 %536 }
 0x3aa   :  { %v531_v3 = vpop.permute.xlu2 %530 }
 0x3ab   :  { %v551_v5 = vsel %vm104_vm1, %v205_v0, %v531_v3 }
 0x3b6   :  { %v529_v63 = vpop.permute.xlu0 %528 }
 0x3b7   :  { %v550_v9 = vsel %vm104_vm1, %v202_v55, %v529_v63 }
 0x3b8   :  { %v552_v11 = vsel %vm142_vm2, %v550_v9, %v537_v6 }
 0x3c6   :  { %v545_v12 = vpop.permute.xlu0 %544 }
 0x3c7   :  { %v555_v14 = vsel %vm554_vm3, %v552_v11, %v545_v12 }
 0x3c8   :  { %823 = vmatmul.msk.f32.vlgmr.msra.gmra.mxu0 %vm51_vm0, %v555_v14 }
 0x3ce   :  { %v539_v4 = vpop.permute.xlu0 %538 }
 0x3cf   :  { %v553_v15 = vsel %vm142_vm2, %v551_v5, %v539_v4 }
 0x3d3   :  { %v547_v16 = vpop.permute.xlu2 %546 }
 0x3d4   :  { %v556_v17 = vsel %vm554_vm3, %v553_v15, %v547_v16 }
 0x3d5   :  { %824 = vmatmul.msk.f32.gmra.mxu0 %vm51_vm0, %v556_v17  ;;  %v35_v17 = vld [vmem:[%s1255_s3 + $0x30] sm:$0xff] }
 0x3d6   :  { %715 = vmatpush.msra.mxu3 %v35_v17 }
 0x445   :  { %v597_v19 = vpop.f32.mrf.mxu0 }
 0x446   :  { %v598_v20 = vadd.f32 %v880_v18, %v597_v19  ;;  %v33_v19 = vld [vmem:[%s1255_s3 + $0x20] sm:$0xff] }
 0x448   :  { %v603_v21 = vadd.f32 %v598_v20, %v1035_v7  ;;  %v883_v20 = vld [vmem:[%s1256_s4 + $0x4] ss:$0 sm:$0xff]  ;;  %s971_s4 = smov [#allocation2]  }
 0x449   :  { %s783_s13 = sshll.u32 %s971_s4, 4  ;;  %s784_s13 = int_to_ptr.vmem [resolvable:$true] %s783_s13 }
 0x44a   :  { %v605_v22 = vsel %vm51_vm0, %v603_v21, 0.0 }
 0x44b   :  { %606 = vadd.xlane.f32.xlu0 %v605_v22 }
 0x452   :  { %v600_v23 = vpop.f32.mrf.mxu0 }
 0x453   :  { %v601_v24 = vadd.f32 %v880_v18, %v600_v23  ;;  %v34_v18 = vld [vmem:[%s1255_s3 + $0x28] sm:$0xff] }
 0x454   :  { %716 = vmatpush.msra.mxu3 %v34_v18 }
 0x455   :  { %v604_v25 = vadd.f32 %v601_v24, %v1045_v8 }
 0x456   :  { %717 = vmatpush.msra.mxu3 %v33_v19 }
 0x457   :  { %v608_v26 = vsel %vm51_vm0, %v604_v25, 0.0 }
 0x458   :  { %609 = vadd.xlane.f32.xlu1 %v608_v26 }
 0x4be   :  { %v607_v7 = vpop.xlane.xlu0 %606 }
 0x4bf   :  { %v618_v13 = vmul.f32 %v1174_v10, %v607_v7 }
 0x4c1   :  { %v620_v35 = vsub.f32 %v603_v21, %v618_v13 }
 0x4c3   :  { %v622_v36 = vmul.f32 %v620_v35, %v620_v35 }
 0x4c5   :  { %v624_v8 = vsel %vm51_vm0, %v622_v36, 0.0 }
 0x4c6   :  { %625 = vadd.xlane.f32.xlu2 %v624_v8 }
 0x4cb   :  { %v610_v37 = vpop.xlane.xlu1 %609 }
 0x4cc   :  { %v619_v38 = vmul.f32 %v1174_v10, %v610_v37 }
 0x4ce   :  { %v621_v40 = vsub.f32 %v604_v25, %v619_v38 }
 0x4d0   :  { %v623_v28 = vmul.f32 %v621_v40, %v621_v40 }
 0x4d2   :  { %v627_v41 = vsel %vm51_vm0, %v623_v28, 0.0 }
 0x4d3   :  { %628 = vadd.xlane.f32.xlu0 %v627_v41 }
 0x539   :  { %v626_v48 = vpop.xlane.xlu2 %625 }
 0x53a   :  { %v630_v49 = vmul.f32 %v626_v48, %v1174_v10 }
 0x53c   :  { %v632_v44 = vadd.f32 1e-05, %v630_v49 }
 0x53e   :  { %921 = vrsqrt.f32 %v632_v44  ;;  %vm640_vm6 = vweird.f32 %v632_v44 }
 0x544   :  { %v922_v51 = vpop.eup %921 }
 0x545   :  { %v635_v53 = vmul.f32 %v922_v51, %v632_v44  ;;  %vm641_vm5 = vweird.f32 %v922_v51 }
 0x546   :  { %v629_v55 = vpop.xlane.xlu0 %628  ;;  %vm642_vm7 = vmor %vm640_vm6, %vm641_vm5 }
 0x547   :  { %v636_v0 = vmul.f32 %v922_v51, %v635_v53  ;;  %v631_v1 = vmul.f32 %v629_v55, %v1174_v10 }
 0x549   :  { %v637_v39 = vmul.f32 0.5, %v636_v0  ;;  %v633_v2 = vadd.f32 1e-05, %v631_v1 }
 0x54b   :  { %v638_v57 = vsub.f32 1.5, %v637_v39  ;;  %923 = vrsqrt.f32 %v633_v2  ;;  %vm650_vm9 = vweird.f32 %v633_v2 }
 0x54d   :  { %v639_v52 = vmul.f32 %v922_v51, %v638_v57 }
 0x54f   :  { %v643_v59 = vsel %vm642_vm7, %v922_v51, %v639_v52 }
 0x550   :  { %v654_v60 = vmul.f32 %v643_v59, %v620_v35 }
 0x551   :  { %v924_v62 = vpop.eup %923 }
 0x552   :  { %v657_v63 = vmul.f32 %v881_v58, %v654_v60  ;;  %v645_v6 = vmul.f32 %v924_v62, %v633_v2  ;;  %vm651_vm8 = vweird.f32 %v924_v62 }
 0x553   :  { %vm652_vm10 = vmor %vm650_vm9, %vm651_vm8 }
 0x554   :  { %v646_v9 = vmul.f32 %v924_v62, %v645_v6  ;;  %v660_v11 = vadd.f32 %v882_v61, %v657_v63 }
 0x556   :  { %v647_v12 = vmul.f32 0.5, %v646_v9  ;;  %825 = vmatmul.msk.f32.vlgmr.msra.gmra.mxu1 %vm51_vm0, %v660_v11 }
 0x558   :  { %v648_v14 = vsub.f32 1.5, %v647_v12 }
 0x55a   :  { %v649_v3 = vmul.f32 %v924_v62, %v648_v14 }
 0x55c   :  { %v653_v4 = vsel %vm652_vm10, %v924_v62, %v649_v3 }
 0x55d   :  { %v655_v5 = vmul.f32 %v653_v4, %v621_v40 }
 0x55f   :  { %v658_v15 = vmul.f32 %v881_v58, %v655_v5 }
 0x561   :  { %v661_v16 = vadd.f32 %v882_v61, %v658_v15 }
 0x563   :  { %826 = vmatmul.msk.f32.gmra.mxu1 %vm51_vm0, %v661_v16 }
 0x5d3   :  { %v686_v21 = vpop.f32.mrf.mxu1 }
 0x5d4   :  { %v687_v22 = vadd.f32 %v883_v20, %v686_v21 }
 0x5d6   :  { %v692_v23 = vmax.f32 %v687_v22, 0.0 }
 0x5d8   :  { %827 = vmatmul.msk.f32.vlgmr.msra.gmra.mxu3 %vm695_vm11, %v692_v23 }
 0x5e0   :  { %v689_v24 = vpop.f32.mrf.mxu1 }
 0x5e1   :  { %v690_v25 = vadd.f32 %v883_v20, %v689_v24 }
 0x5e3   :  { %v693_v26 = vmax.f32 %v690_v25, 0.0 }
 0x5e5   :  { %828 = vmatmul.msk.f32.gmra.mxu3 %vm695_vm11, %v693_v26 }
 0x65b   :  { %v719_v29 = vpop.f32.mrf.mxu3 }
 0x65c   :  { %v720_v30 = vadd.f32 %v884_v27, %v719_v29 }
 0x65e   :  { %v725_v31 = vadd.f32 %v720_v30, %v660_v11 }
 0x660   :  { %v727_v32 = vsel %vm51_vm0, %v725_v31, 0.0 }
 0x661   :  { %728 = vadd.xlane.f32.xlu1 %v727_v32 }
 0x668   :  { %v722_v33 = vpop.f32.mrf.mxu3 }
 0x669   :  { %v723_v7 = vadd.f32 %v884_v27, %v722_v33 }
 0x66b   :  { %v726_v13 = vadd.f32 %v723_v7, %v661_v16 }
 0x66d   :  { %v730_v35 = vsel %vm51_vm0, %v726_v13, 0.0 }
 0x66e   :  { %731 = vadd.xlane.f32.xlu2 %v730_v35 }
 0x6d4   :  { %v729_v36 = vpop.xlane.xlu1 %728 }
 0x6d5   :  { %v733_v8 = vmul.f32 %v729_v36, %v1174_v10 }
 0x6d7   :  { %v735_v37 = vsub.f32 %v725_v31, %v733_v8 }
 0x6d9   :  { %v737_v38 = vmul.f32 %v735_v37, %v735_v37 }
 0x6db   :  { %v739_v40 = vsel %vm51_vm0, %v737_v38, 0.0 }
 0x6dc   :  { %740 = vadd.xlane.f32.xlu0 %v739_v40 }
 0x6e1   :  { %v732_v28 = vpop.xlane.xlu2 %731 }
 0x6e2   :  { %v734_v41 = vmul.f32 %v732_v28, %v1174_v10 }
 0x6e4   :  { %v736_v42 = vsub.f32 %v726_v13, %v734_v41 }
 0x6e6   :  { %v738_v43 = vmul.f32 %v736_v42, %v736_v42 }
 0x6e8   :  { %v742_v45 = vsel %vm51_vm0, %v738_v43, 0.0 }
 0x6e9   :  { %743 = vadd.xlane.f32.xlu1 %v742_v45 }
 0x74f   :  { %v741_v46 = vpop.xlane.xlu0 %740 }
 0x750   :  { %v745_v48 = vmul.f32 %v741_v46, %v1174_v10 }
 0x752   :  { %v747_v49 = vadd.f32 1e-05, %v745_v48 }
 0x754   :  { %925 = vrsqrt.f32 %v747_v49  ;;  %vm755_vm13 = vweird.f32 %v747_v49 }
 0x75a   :  { %v926_v44 = vpop.eup %925 }
 0x75b   :  { %v750_v50 = vmul.f32 %v926_v44, %v747_v49  ;;  %vm756_vm12 = vweird.f32 %v926_v44 }
 0x75c   :  { %v744_v34 = vpop.xlane.xlu1 %743  ;;  %vm757_vm14 = vmor %vm755_vm13, %vm756_vm12 }
 0x75d   :  { %v751_v51 = vmul.f32 %v926_v44, %v750_v50  ;;  %v746_v53 = vmul.f32 %v744_v34, %v1174_v10 }
 0x75f   :  { %v752_v54 = vmul.f32 0.5, %v751_v51  ;;  %v748_v55 = vadd.f32 1e-05, %v746_v53 }
 0x761   :  { %v753_v0 = vsub.f32 1.5, %v752_v54  ;;  %927 = vrsqrt.f32 %v748_v55  ;;  %vm765_vm1 = vweird.f32 %v748_v55 }
 0x763   :  { %v754_v1 = vmul.f32 %v926_v44, %v753_v0 }
 0x765   :  { %v758_v39 = vsel %vm757_vm14, %v926_v44, %v754_v1 }
 0x766   :  { %v769_v2 = vmul.f32 %v758_v39, %v735_v37 }
 0x767   :  { %v928_v57 = vpop.eup %927 }
 0x768   :  { %v772_v10 = vmul.f32 %v885_v47, %v769_v2  ;;  %v760_v52 = vmul.f32 %v928_v57, %v748_v55  ;;  %vm766_vm15 = vweird.f32 %v928_v57 }
 0x769   :  { %vm767_vm2 = vmor %vm765_vm1, %vm766_vm15 }
 0x76a   :  { %v761_v58 = vmul.f32 %v928_v57, %v760_v52  ;;  %v775_v59 = vadd.f32 %v886_v56, %v772_v10 }
 0x76c   :  { %v762_v60 = vmul.f32 0.5, %v761_v58  ;;  %777 = vst.msk [vmem:[#allocation2] sm:$0xff] %vm51_vm0, %v775_v59 }
 0x76e   :  { %v763_v61 = vsub.f32 1.5, %v762_v60 }
 0x770   :  { %v764_v62 = vmul.f32 %v928_v57, %v763_v61 }
 0x772   :  { %v768_v63 = vsel %vm767_vm2, %v928_v57, %v764_v62 }
 0x773   :  { %v770_v6 = vmul.f32 %v768_v63, %v736_v42 }
 0x775   :  { %v773_v9 = vmul.f32 %v885_v47, %v770_v6 }
 0x777   :  { %v776_v11 = vadd.f32 %v886_v56, %v773_v9 }
 0x779   :  { %778 = vst.msk [vmem:[#allocation2 + $0x8] sm:$0xff] %vm51_vm0, %v776_v11 }
 0x77a   :  { %791 = dma.vmem_to_hbm [thread:$0]  %s784_s13, 256, %s786_s12, [#allocation3], %s972_s14, %s972_s14, %s967_s24  }
 0x77b   :  { %953 = dma.done.wait [#allocation3], 256  }
 0x77c   :  { %954 = vsyncadd [#allocation3], 4294967040 }
 0x77d   :  { %796 = vsyncpa [#allocation3], 1 }

</bundles_post_ra>
